<compile_context>
chip_gen: v7x
topology: tpu7x:2x2x1
jax: 0.10.0
libtpu: 0.0.40
codegen_flags: <defaults>
</compile_context>

<pallas_src>
import math
import jax
import jax.numpy as jnp
from jax.experimental import pallas as pl
from jax.experimental.pallas import tpu as pltpu


def _ew_kernel(x_ref, w_ref, b_ref, o_ref):
    # x_ref: (TB, TC, F) slab of input
    # w_ref: (TC, F)     weight tile (resident across the batch grid axis)
    # b_ref: (1, TC)     bias tile
    # o_ref: (TB, TC)    output tile (sublane/lane dense)
    x = x_ref[...].astype(jnp.float32)
    w = w_ref[...].astype(jnp.float32)
    prod = x * w[None, :, :]                      # VPU elementwise
    s = jnp.sum(prod, axis=-1)                    # (TB, TC), f32 accumulation (XLU)
    o_ref[...] = (s + b_ref[...].astype(jnp.float32)).astype(o_ref.dtype)


def _pick_tiles(B, C, F, itemsize):
    """Pick (TB, TC) so the x slab is a few MiB (HBM-roofline friendly) while the
    output block stays (multiple-of-8, multiple-of-128) or full-dim dense."""
    TARGET_X_BYTES = 4 * 1024 * 1024

    # C tile: keep full C unless the (C, F) weight slab is large and C is 128-aligned.
    if C % 128 == 0 and C * F * itemsize > 2 * TARGET_X_BYTES:
        TC = max(128, ((TARGET_X_BYTES // (F * itemsize)) // 128) * 128)
        TC = min(TC, C)
    else:
        TC = C

    row_bytes = TC * F * itemsize
    TB = max(1, TARGET_X_BYTES // row_bytes)
    if TB >= B:
        TB = B                       # whole batch in one tile (full-dim is allowed)
    elif TB >= 8:
        TB = (TB // 8) * 8           # sublane-dense output rows
    else:
        TB = 8 if B > 8 else B       # never emit a <8-row output block unless B is small
    return TB, TC


def _vmem_budget_bytes(TB, TC, F, in_itemsize, out_itemsize):
    x_tile = TB * TC * F * in_itemsize
    w_tile = TC * F * in_itemsize
    b_tile = TC * 4
    o_tile = TB * TC * out_itemsize
    est = 2 * (x_tile + w_tile + b_tile + o_tile)   # double-buffering
    # Generous headroom, but capped at 48 MiB so it also fits v7x (64 MiB physical).
    return int(min(max(2 * est, 32 * 1024 * 1024), 48 * 1024 * 1024))


def element_wise_layer(x, weight, bias=None):
    """x: (B, C, F) ; weight: (C, F) ; bias: (C,) or None -> (B, C)"""
    B, C, F = x.shape
    assert weight.shape == (C, F)
    if bias is None:
        bias = jnp.zeros((C,), dtype=x.dtype)
    bias2d = bias.reshape(1, C)

    itemsize = jnp.dtype(x.dtype).itemsize
    TB, TC = _pick_tiles(B, C, F, itemsize)
    nb = pl.cdiv(B, TB)
    nc = pl.cdiv(C, TC)

    return pl.pallas_call(
        _ew_kernel,
        out_shape=jax.ShapeDtypeStruct((B, C), x.dtype),
        grid_spec=pltpu.PrefetchScalarGridSpec(
            num_scalar_prefetch=0,
            # Batch innermost: the weight/bias block index is constant along it,
            # so the (TC, F) weight tile stays resident across batch steps.
            grid=(nc, nb),
            in_specs=[
                pl.BlockSpec((TB, TC, F), lambda c, b: (b, c, 0)),   # x slab
                pl.BlockSpec((TC, F), lambda c, b: (c, 0)),          # weight tile
                pl.BlockSpec((1, TC), lambda c, b: (0, c)),          # bias tile
            ],
            out_specs=pl.BlockSpec((TB, TC), lambda c, b: (b, c)),
        ),
        compiler_params=pltpu.CompilerParams(
            dimension_semantics=("parallel", "parallel"),
            vmem_limit_bytes=_vmem_budget_bytes(TB, TC, F, itemsize, itemsize),
        ),
    )(x, weight, bias2d)


if __name__ == "__main__":
    # --- Small shapes consistent with the module's forward. ---
    B, in_features, out_features = 2, 16, 32

    key = jax.random.PRNGKey(0)
    kx, kw, kb = jax.random.split(key, 3)

    # Deterministic parameter init mirroring reset_parameters():
    # uniform(-stdv, stdv) with stdv = 1/sqrt(out_features)
    stdv = 1.0 / math.sqrt(out_features)
    weight = jax.random.uniform(
        kw, (in_features, out_features), jnp.float32, minval=-stdv, maxval=stdv
    )
    bias = jax.random.uniform(
        kb, (in_features,), jnp.float32, minval=-stdv, maxval=stdv
    )
    x = jax.random.normal(kx, (B, in_features, out_features), jnp.float32)

    out = jax.block_until_ready(element_wise_layer(x, weight, bias))
    ref = jnp.sum(x * weight[None, :, :], axis=2) + bias[None, :]
    assert out.shape == (B, in_features)
    assert jnp.allclose(out, ref, atol=1e-5, rtol=1e-5), "mismatch vs reference (small)"

    # --- Moderate shapes that exercise the multi-row (TB<B) tiled path. ---
    B2, C2, F2 = 64, 256, 256
    kx2, kw2, kb2 = jax.random.split(jax.random.PRNGKey(1), 3)
    stdv2 = 1.0 / math.sqrt(F2)
    w2 = jax.random.uniform(kw2, (C2, F2), jnp.float32, minval=-stdv2, maxval=stdv2)
    b2 = jax.random.uniform(kb2, (C2,), jnp.float32, minval=-stdv2, maxval=stdv2)
    x2 = jax.random.normal(kx2, (B2, C2, F2), jnp.float32)

    out2 = jax.block_until_ready(element_wise_layer(x2, w2, b2))
    ref2 = jnp.sum(x2 * w2[None, :, :], axis=2) + b2[None, :]
    assert out2.shape == (B2, C2)
    assert jnp.allclose(out2, ref2, atol=1e-4, rtol=1e-4), "mismatch vs reference (tiled)"

    print("KERNEL_OK")
</pallas_src>

<mosaic_0001>
module attributes {stable_mosaic.version = 11 : i64} {
  func.func @_ew_kernel(%arg0: i32, %arg1: i32, %arg2: memref<2x16x32xf32, #tpu.memory_space<vmem>>, %arg3: memref<16x32xf32, #tpu.memory_space<vmem>>, %arg4: memref<1x16xf32, #tpu.memory_space<vmem>>, %arg5: memref<2x16xf32, #tpu.memory_space<vmem>>) attributes {dimension_semantics = [#tpu.dimension_semantics<parallel>, #tpu.dimension_semantics<parallel>], iteration_bounds = array<i64: 1, 1>, scalar_prefetch = 0 : i64, scratch_operands = 0 : i64, tpu.core_type = #tpu.core_type<tc>, window_params = [{transform_indices = @transform_0, window_bounds = array<i64: 2, 16, 32>}, {transform_indices = @transform_1, window_bounds = array<i64: 16, 32>}, {transform_indices = @transform_2, window_bounds = array<i64: 1, 16>}, {transform_indices = @transform_3, window_bounds = array<i64: 2, 16>}]} {
    %c0 = arith.constant 0 : index
    %c0_0 = arith.constant 0 : index
    %c0_1 = arith.constant 0 : index
    %0 = vector.load %arg2[%c0, %c0_0, %c0_1] : memref<2x16x32xf32, #tpu.memory_space<vmem>>, vector<2x16x32xf32>
    %c0_2 = arith.constant 0 : index
    %c0_3 = arith.constant 0 : index
    %1 = vector.load %arg3[%c0_2, %c0_3] : memref<16x32xf32, #tpu.memory_space<vmem>>, vector<16x32xf32>
    %2 = vector.shape_cast %1 : vector<16x32xf32> to vector<1x16x32xf32>
    %3 = vector.broadcast %2 : vector<1x16x32xf32> to vector<2x16x32xf32>
    %4 = arith.mulf %0, %3 : vector<2x16x32xf32>
    %cst = arith.constant dense<0.000000e+00> : vector<2x16xf32>
    %5 = vector.multi_reduction <add>, %4, %cst [2] : vector<2x16x32xf32> to vector<2x16xf32>
    %c0_4 = arith.constant 0 : index
    %c0_5 = arith.constant 0 : index
    %6 = vector.load %arg4[%c0_4, %c0_5] : memref<1x16xf32, #tpu.memory_space<vmem>>, vector<1x16xf32>
    %7 = vector.broadcast %6 : vector<1x16xf32> to vector<2x16xf32>
    %8 = arith.addf %5, %7 : vector<2x16xf32>
    %c0_6 = arith.constant 0 : index
    %c0_7 = arith.constant 0 : index
    %9 = vector.load %arg5[%c0_6, %c0_7] : memref<2x16xf32, #tpu.memory_space<vmem>>, vector<2x16xf32>
    tpu.vector_store %arg5[%c0_6, %c0_7], %8 {strides = array<i32>} : memref<2x16xf32, #tpu.memory_space<vmem>>, vector<2x16xf32>,
    return
  }
  func.func @transform_0(%arg0: i32, %arg1: i32) -> (i32, i32, i32) {
    %c0_i32 = arith.constant 0 : i32
    %c0_i32_0 = arith.constant 0 : i32
    return %arg1, %arg0, %c0_i32 : i32, i32, i32
  }
  func.func @transform_1(%arg0: i32, %arg1: i32) -> (i32, i32) {
    %c0_i32 = arith.constant 0 : i32
    %c0_i32_0 = arith.constant 0 : i32
    return %arg0, %c0_i32 : i32, i32
  }
  func.func @transform_2(%arg0: i32, %arg1: i32) -> (i32, i32) {
    %c0_i32 = arith.constant 0 : i32
    %c0_i32_0 = arith.constant 0 : i32
    return %c0_i32, %arg0 : i32, i32
  }
  func.func @transform_3(%arg0: i32, %arg1: i32) -> (i32, i32) {
    %c0_i32 = arith.constant 0 : i32
    return %arg1, %arg0 : i32, i32
  }
}

</mosaic_0001>

<bundles_post_ra>
// kernel: tpu_custom_call.1
= control target key start
LH: loop header
LB: loop body
LE: loop exit
PB: predicated region body
PF: predicated region fallthrough
CT: control target
= control target key end

     0   :  { %8 = vsyncpa [#allocation3], 0  ;;  %s290_s0 = inlined_call_operand.hbm [shape: f32[2,16,32], index: 0, kind: input, shape index: {}]   ;;  %s291_s1 = inlined_call_operand.hbm [shape: f32[16,32], index: 1, kind: input, shape index: {}]   ;;  %s292_s2 = inlined_call_operand.vmem [shape: f32[1,16], index: 2, kind: input, shape index: {}]   ;;  %s293_s3 = inlined_call_operand.hbm [shape: f32[2,16], index: 3, kind: output, shape index: {}]  }
   0x1   :  { %9 = vsyncpa [#allocation6], 0 }
   0x2   :  { %10 = vsyncpa [#allocation4], 0  ;;  %s225_s12 = smov [#allocation2]   ;;  %s153_s16 = scalar_lea.hbm %s290_s0, 512 }
   0x3   :  { %s16_s13 = sshll.u32 %s225_s12, 4  ;;  %p154_p0 = scmp.ne.s32.totalorder %s290_s0, %s153_s16  ;;  %s17_s13 = int_to_ptr.vmem [resolvable:$true] %s16_s13 }
   0x4   :  { %p157_p1 = scmp.lt.u32.totalorder %s153_s16, %s290_s0 }
   0x6   :  { %p159_p2 = pnand %p157_p1, %p154_p0 }
   0x8   :  { %162 = shalt.err (!%p159_p2)
}
   0x9   :  { %s163_s21 = scalar_lea.vmem %s17_s13, 512  ;;  %p168_p4 = scmp.lt.s32.totalorder %s17_s13, %s17_s13 }
   0xa   :  { %p164_p3 = scmp.ne.s32.totalorder %s17_s13, %s163_s21  ;;  %p169_p5 = scmp.lt.s32.totalorder %s163_s21, %s163_s21 }
   0xc   :  { %p170_p6 = por %p169_p5, %p168_p4 }
   0xe   :  { %p171_p7 = pnand %p170_p6, %p164_p3 }
  0x10   :  { %174 = shalt.err (!%p171_p7)
}
  0x11   :  { %s226_s22 = smov 128   ;;  %s227_s23 = smov 8  }
  0x12   :  { %22 = dma.hbm_to_vmem [thread:$0]  %s290_s0, 512, %s17_s13, [#allocation3], %s226_s22, %s226_s22, %s227_s23  }
  0x13   :  { %s228_s26 = smov [#allocation5]   ;;  %s175_s30 = scalar_lea.hbm %s291_s1, 256 }
  0x14   :  { %s28_s27 = sshll.u32 %s228_s26, 4  ;;  %p176_p8 = scmp.ne.s32.totalorder %s291_s1, %s175_s30  ;;  %s29_s27 = int_to_ptr.vmem [resolvable:$true] %s28_s27 }
  0x15   :  { %p179_p9 = scmp.lt.u32.totalorder %s175_s30, %s291_s1 }
  0x17   :  { %p181_p10 = pnand %p179_p9, %p176_p8 }
  0x19   :  { %184 = shalt.err (!%p181_p10)
}
  0x1a   :  { %s185_s8 = scalar_lea.vmem %s29_s27, 256  ;;  %p190_p12 = scmp.lt.s32.totalorder %s29_s27, %s29_s27 }
  0x1b   :  { %p186_p11 = scmp.ne.s32.totalorder %s29_s27, %s185_s8  ;;  %p191_p13 = scmp.lt.s32.totalorder %s185_s8, %s185_s8 }
  0x1d   :  { %p192_p0 = por %p191_p13, %p190_p12 }
  0x1f   :  { %p193_p1 = pnand %p192_p0, %p186_p11 }
  0x21   :  { %196 = shalt.err (!%p193_p1)
}
  0x22   :  { %34 = dma.hbm_to_vmem [thread:$0]  %s291_s1, 256, %s29_s27, [#allocation6], %s226_s22, %s226_s22, %s227_s23  }
  0x23   :  { %219 = dma.done.wait [#allocation3], 512  }
  0x24   :  { %220 = vsyncadd [#allocation3], 4294966784 }
  0x25   :  { %221 = dma.done.wait [#allocation6], 256  }
  0x26   :  { %222 = vsyncadd [#allocation6], 4294967040  ;;  %v45_v0 = vld [vmem:[#allocation2 + $0x10] sm:$0xff]  ;;  %v47_v1 = vld [vmem:[#allocation5] sm:$0xff]  ;;  %vm53_vm0 = vcmask 261120   ;;  %v229_v15 = vmov 0   ;;  %v101_v26 = vlaneseq }
  0x27   :  { %v43_v2 = vld [vmem:[#allocation2] sm:$0xff]  ;;  %v51_v3 = vmul.f32 %v47_v1, %v45_v0  ;;  %v46_v5 = vld [vmem:[#allocation2 + $0x18] sm:$0xff]  ;;  %v48_v6 = vld [vmem:[#allocation5 + $0x8] sm:$0xff]  ;;  %152 = vset.pattern.permute.xlu0 %v229_v15  ;;  %151 = vset.pattern.permute.xlu1 %v229_v15  ;;  %vm112_vm1 = vcmask 130112   ;;  %vm123_vm2 = vcmask 1041409   ;;  %vm126_vm3 = vcmask 123904  }
  0x28   :  { %v49_v4 = vmul.f32 %v47_v1, %v43_v2  ;;  %v44_v7 = vld [vmem:[#allocation2 + $0x8] sm:$0xff]  ;;  %v52_v8 = vmul.f32 %v48_v6, %v46_v5  ;;  %v144_v14 = vld [vmem:[%s292_s2] ss:$0 sm:$0xff]  ;;  %v102_v27 = vand.u32 127, %v101_v26  ;;  %v104_v30 = vshrl.u32 %v101_v26, 7  ;;  %s230_s2 = smov [#allocation7]  }
  0x29   :  { %v50_v9 = vmul.f32 %v48_v6, %v44_v7  ;;  %v60_v10 = vsel %vm53_vm0, %v51_v3, 0.0  ;;  %s134_s11 = sshll.u32 %s230_s2, 4  ;;  %s135_s11 = int_to_ptr.vmem [resolvable:$true] %s134_s11 }
  0x2a   :  { %v54_v11 = vsel %vm53_vm0, %v49_v4, 0.0  ;;  %61 = vadd.xlane.f32.xlu1 %v60_v10  ;;  %v63_v12 = vsel %vm53_vm0, %v52_v8, 0.0  ;;  %v107_v28 = vadd.s32 4294967288, %v102_v27  ;;  %v105_v33 = vsub.s32 %v102_v27, %v104_v30  ;;  %s197_s12 = scalar_lea.vmem %s135_s11, 32  ;;  %p202_p3 = scmp.lt.s32.totalorder %s135_s11, %s135_s11 }
  0x2b   :  { %55 = vadd.xlane.f32.xlu0 %v54_v11  ;;  %v57_v13 = vsel %vm53_vm0, %v50_v9, 0.0  ;;  %p198_p2 = scmp.ne.s32.totalorder %s135_s11, %s197_s12  ;;  %p203_p4 = scmp.lt.s32.totalorder %s197_s12, %s197_s12 }
  0x2c   :  { %v110_v31 = vsub.s32 %v107_v28, %v104_v30 }
  0x2d   :  { %p204_p5 = por %p203_p4, %p202_p3 }
  0x2e   :  { %64 = vadd.xlane.f32.xlu1 %v63_v12 }
  0x2f   :  { %58 = vadd.xlane.f32.xlu0 %v57_v13  ;;  %p205_p6 = pnand %p204_p5, %p198_p2 }
  0x3f   :  { %77 = vbcast.lane.b32.xlu1 %v144_v14, 264 }
  0x45   :  { %73 = vbcast.lane.b32.xlu0 %v144_v14, 256 }
  0xb7   :  { %v62_v16 = vpop.xlane.xlu1 %61 }
  0xb8   :  { %v56_v17 = vpop.xlane.xlu0 %55 }
  0xbb   :  { %v65_v18 = vpop.xlane.xlu1 %64 }
  0xbc   :  { %v59_v19 = vpop.xlane.xlu0 %58 }
  0xbf   :  { %v78_v23 = vpop.permute.xlu1 %77 }
  0xc0   :  { %v74_v20 = vpop.permute.xlu0 %73  ;;  %v82_v24 = vadd.f32 %v78_v23, %v59_v19  ;;  %v84_v25 = vadd.f32 %v78_v23, %v65_v18 }
  0xc1   :  { %v81_v21 = vadd.f32 %v74_v20, %v56_v17  ;;  %v83_v22 = vadd.f32 %v74_v20, %v62_v16 }
  0xc3   :  { %96 = vperm.xlu0 %152, %v83_v22   ;;  %90 = vperm.xlu1 %151, %v81_v21  }
  0xc7   :  { %93 = vperm.xlu1 %151, %v82_v24  }
  0xcb   :  { %99 = vperm.xlu1 %151, %v84_v25  }
 0x142   :  { %v91_v29 = vpop.permute.xlu1 %90  ;;  %v97_v34 = vpop.permute.xlu0 %96 }
 0x143   :  { %v117_v37 = vrot.slane %v97_v34, %v105_v33  ;;  %v106_v38 = vrot.slane %v91_v29, %v105_v33 }
 0x146   :  { %v94_v32 = vpop.permute.xlu1 %93 }
 0x147   :  { %v111_v35 = vrot.slane %v94_v32, %v110_v31 }
 0x149   :  { %v113_v40 = vsel %vm112_vm1, %v111_v35, %v106_v38 }
 0x14a   :  { %v100_v36 = vpop.permute.xlu1 %99 }
 0x14b   :  { %v121_v39 = vrot.slane %v100_v36, %v110_v31 }
 0x14d   :  { %v122_v41 = vsel %vm112_vm1, %v121_v39, %v117_v37 }
 0x14e   :  { %v124_v42 = vsel %vm123_vm2, %v122_v41, %v113_v40 }
 0x14f   :  { %127 = vst.msk [vmem:[#allocation7] sm:$0x3] %vm126_vm3, %v124_v42 }
 0x150   :  { %208 = shalt.err (!%p205_p6)
}
 0x151   :  { %s209_s15 = scalar_lea.hbm %s293_s3, 32 }
 0x152   :  { %p210_p7 = scmp.ne.s32.totalorder %s293_s3, %s209_s15  ;;  %p213_p8 = scmp.lt.u32.totalorder %s209_s15, %s293_s3 }
 0x154   :  { %p215_p9 = pnand %p213_p8, %p210_p7 }
 0x156   :  { %218 = shalt.err (!%p215_p9)
}
 0x157   :  { %137 = dma.vmem_to_hbm [thread:$0]  %s135_s11, 32, %s293_s3, [#allocation4]  }
 0x158   :  { %223 = dma.done.wait [#allocation4], 32  }
 0x159   :  { %224 = vsyncadd [#allocation4], 4294967264 }
 0x15a   :  { %141 = vsyncpa [#allocation3], 1 }
 0x15b   :  { %142 = vsyncpa [#allocation6], 1 }
 0x15c   :  { %143 = vsyncpa [#allocation4], 1 }

</bundles_post_ra>
